<compile_context>
chip_gen: v7x
topology: tpu7x:2x2x1
jax: 0.10.0
libtpu: 0.0.40
codegen_flags: <defaults>
</compile_context>

<pallas_src>
import functools
import math

import jax
import jax.numpy as jnp
from jax.experimental import pallas as pl
from jax.experimental.pallas import tpu as pltpu

LANE = 128          # lane width: node / feature padding granularity
NEG_INF = -1e30     # mask value (f32-only; never cast to bf16)


def _round_up(x, m):
    return ((x + m - 1) // m) * m


# ---------------------------------------------------------------------------
# Kernel 1: fused Q|K|V|Skip projection for one TransformerConv layer.
# One wide bf16 MXU matmul per node tile instead of four narrow ones.
# ---------------------------------------------------------------------------
def _proj_kernel(h_ref, w_ref, b_ref, o_ref):
    o_ref[...] = (
        jnp.dot(h_ref[...], w_ref[...], preferred_element_type=jnp.float32)
        + b_ref[...]
    ).astype(o_ref.dtype)


def fused_qkvs_projection(h, w_fused, b_fused, *, tile_n=128):
    n_pad, c_in = h.shape
    d_out = w_fused.shape[1]
    return pl.pallas_call(
        _proj_kernel,
        out_shape=jax.ShapeDtypeStruct((n_pad, d_out), jnp.bfloat16),
        grid=(n_pad // tile_n,),
        in_specs=[
            pl.BlockSpec((tile_n, c_in), lambda i: (i, 0)),
            pl.BlockSpec((c_in, d_out), lambda i: (0, 0)),   # weights: constant block
            pl.BlockSpec((1, d_out), lambda i: (0, 0)),
        ],
        out_specs=pl.BlockSpec((tile_n, d_out), lambda i: (i, 0)),
        compiler_params=pltpu.CompilerParams(dimension_semantics=("parallel",)),
    )(h, w_fused, b_fused)


# ---------------------------------------------------------------------------
# Kernel 2: flash-style masked multi-head attention + skip + ReLU.
# grid = (q_tiles, kv_tiles); online softmax state (m, l, acc) lives in VMEM
# scratch and persists across the kv ("arbitrary") axis.
# ---------------------------------------------------------------------------
def _attn_kernel(q_ref, k_ref, v_ref, s_ref, adj_ref, o_ref,
                 acc_ref, m_ref, l_ref, *, heads, ch_blk, scale):
    kj = pl.program_id(1)

    @pl.when(kj == 0)
    def _init():
        acc_ref[...] = jnp.zeros_like(acc_ref)
        m_ref[...] = jnp.full_like(m_ref, NEG_INF)
        l_ref[...] = jnp.zeros_like(l_ref)

    # adjacency tile (bf16 in HBM -> half the N^2 DMA traffic), bool mask once.
    mask = adj_ref[...] > 0                                       # [tq, tk]

    # Static per-head loop; results go straight into the acc scratch slab
    # (no jnp.stack / jnp.concatenate head split/merge).
    for h in range(heads):
        cs = slice(h * ch_blk, (h + 1) * ch_blk)
        q_h = q_ref[:, cs]                                        # [tq, ch] bf16
        k_h = k_ref[:, cs]                                        # [tk, ch] bf16
        v_h = v_ref[:, cs]                                        # [tk, ch] bf16

        s = jax.lax.dot_general(                                  # q . k^T (bf16 MXU)
            q_h, k_h, (((1,), (1,)), ((), ())),
            preferred_element_type=jnp.float32) * scale           # [tq, tk] f32
        s = jnp.where(mask, s, NEG_INF)

        m_prev = m_ref[:, h:h + 1]
        m_new = jnp.maximum(m_prev, jnp.max(s, axis=-1, keepdims=True))
        p = jnp.where(mask, jnp.exp(s - m_new), 0.0)              # f32 softmax math
        corr = jnp.exp(m_prev - m_new)
        l_ref[:, h:h + 1] = corr * l_ref[:, h:h + 1] + jnp.sum(p, -1, keepdims=True)
        m_ref[:, h:h + 1] = m_new
        acc_ref[:, cs] = corr * acc_ref[:, cs] + jnp.dot(
            p.astype(v_h.dtype), v_h, preferred_element_type=jnp.float32)

    @pl.when(kj == pl.num_programs(1) - 1)
    def _finalize():
        for h in range(heads):
            cs = slice(h * ch_blk, (h + 1) * ch_blk)
            # exact division (review: approx reciprocal was free accuracy lost);
            # isolated / padded targets have l == 0 and acc == 0 -> output 0.
            inv = 1.0 / jnp.maximum(l_ref[:, h:h + 1], 1e-20)
            acc_ref[:, cs] = acc_ref[:, cs] * inv
        out = acc_ref[...] + s_ref[...].astype(jnp.float32)       # + skip (root weight)
        o_ref[...] = jnp.maximum(out, 0.0).astype(o_ref.dtype)    # fused ReLU


def transformer_conv(qkvs, adj, *, heads, ch_blk, scale,
                     out_dtype=jnp.bfloat16, tile_q=128, tile_k=128):
    n_pad = adj.shape[0]
    d_pad = heads * ch_blk
    kern = functools.partial(_attn_kernel, heads=heads, ch_blk=ch_blk, scale=scale)
    return pl.pallas_call(
        kern,
        out_shape=jax.ShapeDtypeStruct((n_pad, d_pad), out_dtype),
        grid=(n_pad // tile_q, n_pad // tile_k),
        in_specs=[
            # the same qkvs array is passed four times; the feature-axis block
            # index (0..3) selects the Q / K / V / Skip segment.
            pl.BlockSpec((tile_q, d_pad), lambda qi, kj: (qi, 0)),   # Q  (target tile)
            pl.BlockSpec((tile_k, d_pad), lambda qi, kj: (kj, 1)),   # K  (source tile)
            pl.BlockSpec((tile_k, d_pad), lambda qi, kj: (kj, 2)),   # V  (source tile)
            pl.BlockSpec((tile_q, d_pad), lambda qi, kj: (qi, 3)),   # Skip
            pl.BlockSpec((tile_q, tile_k), lambda qi, kj: (qi, kj)), # adjacency tile
        ],
        out_specs=pl.BlockSpec((tile_q, d_pad), lambda qi, kj: (qi, 0)),
        scratch_shapes=[
            pltpu.VMEM((tile_q, d_pad), jnp.float32),   # acc
            pltpu.VMEM((tile_q, heads), jnp.float32),   # running max per head
            pltpu.VMEM((tile_q, heads), jnp.float32),   # running denom per head
        ],
        compiler_params=pltpu.CompilerParams(
            dimension_semantics=("parallel", "arbitrary")),
    )(qkvs, qkvs, qkvs, qkvs, adj)


# ---------------------------------------------------------------------------
# Kernel 3: global mean pool + classifier + log_softmax (lane-padded logits).
# ---------------------------------------------------------------------------
def _pool_head_kernel(onehot_ref, invc_ref, h_ref, w_ref, b_ref, o_ref):
    # exact mean: 0/1 bf16 one-hot sum (exact) * f32 inverse counts
    pooled = jnp.dot(onehot_ref[...], h_ref[...],
                     preferred_element_type=jnp.float32) * invc_ref[...]
    logits = jnp.dot(pooled, w_ref[...],
                     preferred_element_type=jnp.float32) + b_ref[...]
    mx = jnp.max(logits, axis=-1, keepdims=True)
    lse = mx + jnp.log(jnp.sum(jnp.exp(logits - mx), axis=-1, keepdims=True))
    o_ref[...] = logits - lse


def pool_and_classify(onehot, inv_count, h, lin_w_pad, lin_b_pad):
    n_graphs = onehot.shape[0]
    o_pad = lin_w_pad.shape[1]
    args = (onehot, inv_count, h, lin_w_pad, lin_b_pad)

    def full(shape):
        nd = len(shape)
        return pl.BlockSpec(shape, lambda i, nd=nd: (0,) * nd)

    return pl.pallas_call(
        _pool_head_kernel,
        out_shape=jax.ShapeDtypeStruct((n_graphs, o_pad), jnp.float32),
        grid=(1,),
        in_specs=[full(a.shape) for a in args],
        out_specs=full((n_graphs, o_pad)),
        compiler_params=pltpu.CompilerParams(dimension_semantics=("arbitrary",)),
    )(*args)


# ---------------------------------------------------------------------------
# Host wrapper: padding, fused/packed weights, per-layer kernel launches.
# ---------------------------------------------------------------------------
def protein_graph_transformer(x, edge_index, batch, conv_params, conv_cfgs,
                              lin_w, lin_b, num_graphs):
    n_nodes, c_in0 = x.shape
    n_pad = _round_up(max(n_nodes, LANE), LANE)          # lane-dense node axis

    # Dense adjacency, bf16 storage: adj[i, j] = 1 iff edge j -> i.
    adj = jnp.zeros((n_pad, n_pad), jnp.bfloat16)
    adj = adj.at[edge_index[1], edge_index[0]].set(1.0)

    h = jnp.zeros((n_pad, c_in0), jnp.bfloat16).at[:n_nodes].set(
        x.astype(jnp.bfloat16))

    # column position of each real input feature inside the (possibly padded)
    # activation layout produced by the previous layer
    in_cols = jnp.arange(c_in0)

    for (wq, bq, wk, bk, wv, bv, ws, bs), (heads, ch) in zip(conv_params, conv_cfgs):
        d_real = heads * ch
        d_pad = _round_up(d_real, LANE)
        ch_blk = d_pad // heads                # per-head slab width inside the kernel
        c_in_pad = h.shape[1]
        # padded column of each real output feature (head-major layout)
        out_cols = (jnp.arange(d_real) // ch) * ch_blk + (jnp.arange(d_real) % ch)

        # Pack Wq|Wk|Wv|Ws into one [Cin_pad, 4*Dh_pad] matrix (padded slots zero).
        w_fused = jnp.zeros((c_in_pad, 4 * d_pad), jnp.float32)
        b_fused = jnp.zeros((1, 4 * d_pad), jnp.float32)
        for seg, (w, b) in enumerate(((wq, bq), (wk, bk), (wv, bv), (ws, bs))):
            cols = seg * d_pad + out_cols
            w_fused = w_fused.at[in_cols[:, None], cols[None, :]].set(w.T)
            b_fused = b_fused.at[0, cols].set(b[0])
        w_fused = w_fused.astype(jnp.bfloat16)

        qkvs = fused_qkvs_projection(h, w_fused, b_fused)
        h = transformer_conv(qkvs, adj, heads=heads, ch_blk=ch_blk,
                             scale=1.0 / math.sqrt(ch))
        in_cols = out_cols

    # global mean pool + classifier (128-lane padded logits, sliced on host).
    batch_pad = jnp.full((n_pad,), -1, jnp.int32).at[:n_nodes].set(
        batch.astype(jnp.int32))
    onehot_f = (batch_pad[None, :] == jnp.arange(num_graphs)[:, None]).astype(
        jnp.float32)
    onehot = onehot_f.astype(jnp.bfloat16)
    inv_count = 1.0 / jnp.maximum(jnp.sum(onehot_f, axis=1, keepdims=True), 1.0)

    out_ch = lin_w.shape[0]
    o_pad = _round_up(out_ch, LANE)
    d_last_pad = h.shape[1]
    lin_w_pad = jnp.zeros((d_last_pad, o_pad), jnp.float32)
    lin_w_pad = lin_w_pad.at[in_cols[:, None], jnp.arange(out_ch)[None, :]].set(lin_w.T)
    lin_b_pad = jnp.full((1, o_pad), NEG_INF, jnp.float32).at[0, :out_ch].set(lin_b[0])

    logp = pool_and_classify(onehot, inv_count, h, lin_w_pad, lin_b_pad)
    return logp[:, :out_ch]


# ---------------------------------------------------------------------------
# Pure-JAX references.
#   match_kernel_precision=True  : mirrors the kernel's bf16 MXU-input casts
#                                  (structural check, tight tolerance)
#   match_kernel_precision=False : full-f32 module semantics (loose tolerance;
#                                  difference is the deliberate bf16 MXU choice)
# ---------------------------------------------------------------------------
def _reference_forward(x, edge_index, batch, conv_params, conv_cfgs,
                       lin_w, lin_b, num_graphs, match_kernel_precision):
    if match_kernel_precision:
        act_dt, prec = jnp.bfloat16, None
    else:
        act_dt, prec = jnp.float32, jax.lax.Precision.HIGHEST

    n = x.shape[0]
    adj = jnp.zeros((n, n), jnp.float32).at[edge_index[1], edge_index[0]].set(1.0)
    mask = adj > 0
    h = x.astype(act_dt)
    for (wq, bq, wk, bk, wv, bv, ws, bs), (heads, ch) in zip(conv_params, conv_cfgs):
        def proj(w, b):
            return (jnp.dot(h, w.T.astype(act_dt),
                            preferred_element_type=jnp.float32, precision=prec)
                    + b).astype(act_dt)
        q, k, v, skip = proj(wq, bq), proj(wk, bk), proj(wv, bv), proj(ws, bs)
        qh = q.reshape(n, heads, ch).transpose(1, 0, 2)
        kh = k.reshape(n, heads, ch).transpose(1, 0, 2)
        vh = v.reshape(n, heads, ch).transpose(1, 0, 2)
        s = jnp.einsum("hid,hjd->hij", qh, kh, preferred_element_type=jnp.float32,
                       precision=prec) / math.sqrt(ch)
        s = jnp.where(mask[None], s, NEG_INF)
        m = jnp.max(s, axis=-1, keepdims=True)
        p = jnp.where(mask[None], jnp.exp(s - m), 0.0)
        out = jnp.einsum("hij,hjd->hid", p.astype(act_dt), vh,
                         preferred_element_type=jnp.float32, precision=prec)
        out = out / jnp.maximum(jnp.sum(p, axis=-1, keepdims=True), 1e-20)
        out = out.transpose(1, 0, 2).reshape(n, heads * ch)
        h = jnp.maximum(out + skip.astype(jnp.float32), 0.0).astype(act_dt)

    onehot = (batch[None, :] == jnp.arange(num_graphs)[:, None])
    counts = jnp.maximum(jnp.sum(onehot.astype(jnp.float32), 1, keepdims=True), 1.0)
    pooled = jnp.dot(onehot.astype(act_dt), h,
                     preferred_element_type=jnp.float32, precision=prec) / counts
    logits = jnp.dot(pooled, lin_w.T, preferred_element_type=jnp.float32,
                     precision=jax.lax.Precision.HIGHEST) + lin_b
    return logits - jax.nn.logsumexp(logits, axis=-1, keepdims=True)


# ---------------------------------------------------------------------------
# Deterministic parameter init (PyTorch-style layouts: W [out, in], b [1, out])
# ---------------------------------------------------------------------------
def init_conv_params(key, in_ch, ch, heads):
    dims = heads * ch
    ks = jax.random.split(key, 8)
    n = lambda k, s: 0.1 * jax.random.normal(k, s, jnp.float32)
    wq, bq = n(ks[0], (dims, in_ch)), n(ks[1], (1, dims))
    wk, bk = n(ks[2], (dims, in_ch)), n(ks[3], (1, dims))
    wv, bv = n(ks[4], (dims, in_ch)), n(ks[5], (1, dims))
    ws, bs = n(ks[6], (dims, in_ch)), n(ks[7], (1, dims))
    return (wq, bq, wk, bk, wv, bv, ws, bs)


if __name__ == "__main__":
    # Model config (small): in=16, hidden=32, out=10, num_layers=4, heads=8
    in_channels, hidden, out_channels, heads = 16, 32, 10, 8
    n_nodes, num_graphs = 16, 2              # 2 graphs of 8 nodes each

    key = jax.random.PRNGKey(0)
    keys = jax.random.split(key, 8)
    x = jax.random.normal(keys[0], (n_nodes, in_channels), jnp.float32)

    # Two ring graphs (both directions) -> every node has incoming edges.
    srcs, dsts = [], []
    for g in range(num_graphs):
        base = g * 8
        for i in range(8):
            a, b = base + i, base + (i + 1) % 8
            srcs += [a, b]
            dsts += [b, a]
    edge_index = jnp.array([srcs, dsts], dtype=jnp.int32)        # [2, 32]
    batch = jnp.array([0] * 8 + [1] * 8, dtype=jnp.int32)        # [16]

    # Conv stack: (in->hidden, heads=8), 2x (hidden*heads->hidden, heads=8),
    #             (hidden*heads->hidden, heads=1)
    conv_cfgs = [(heads, hidden), (heads, hidden), (heads, hidden), (1, hidden)]
    conv_in = [in_channels, hidden * heads, hidden * heads, hidden * heads]
    conv_params = [init_conv_params(keys[1 + i], conv_in[i], hidden, conv_cfgs[i][0])
                   for i in range(4)]

    lin_w = 0.1 * jax.random.normal(keys[5], (out_channels, hidden), jnp.float32)
    lin_b = 0.1 * jax.random.normal(keys[6], (1, out_channels), jnp.float32)

    out = protein_graph_transformer(x, edge_index, batch, conv_params, conv_cfgs,
                                    lin_w, lin_b, num_graphs)
    out = jax.block_until_ready(out)
    assert out.shape == (num_graphs, out_channels)

    # Structural check: reference that mirrors the kernel's bf16 MXU-input casts.
    ref_bf16 = _reference_forward(x, edge_index, batch, conv_params, conv_cfgs,
                                  lin_w, lin_b, num_graphs, True)
    assert jnp.allclose(out, ref_bf16, atol=5e-3, rtol=5e-3), \
        "mismatch vs bf16-matched JAX reference"

    # Semantic check vs the full-f32 module math; looser tolerance only because
    # of the deliberate bf16 MXU-input optimization across 4 layers.
    ref_f32 = _reference_forward(x, edge_index, batch, conv_params, conv_cfgs,
                                 lin_w, lin_b, num_graphs, False)
    assert jnp.allclose(out, ref_f32, atol=1e-1), "mismatch vs f32 JAX reference"

    print("KERNEL_OK")
</pallas_src>

<mosaic_0001>
module attributes {stable_mosaic.version = 11 : i64} {
  func.func @_proj_kernel(%arg0: i32, %arg1: memref<128x16xbf16, #tpu.memory_space<vmem>>, %arg2: memref<16x1024xbf16, #tpu.memory_space<vmem>>, %arg3: memref<1x1024xf32, #tpu.memory_space<vmem>>, %arg4: memref<128x1024xbf16, #tpu.memory_space<vmem>>) attributes {dimension_semantics = [#tpu.dimension_semantics<parallel>], iteration_bounds = array<i64: 1>, scalar_prefetch = 0 : i64, scratch_operands = 0 : i64, tpu.core_type = #tpu.core_type<tc>, window_params = [{transform_indices = @transform_0, window_bounds = array<i64: 128, 16>}, {pipeline_mode = #tpu.pipeline_mode<synchronous>, transform_indices = @transform_1, window_bounds = array<i64: 16, 1024>}, {pipeline_mode = #tpu.pipeline_mode<synchronous>, transform_indices = @transform_2, window_bounds = array<i64: 1, 1024>}, {transform_indices = @transform_3, window_bounds = array<i64: 128, 1024>}]} {
    %c0 = arith.constant 0 : index
    %c0_0 = arith.constant 0 : index
    %0 = vector.load %arg1[%c0, %c0_0] : memref<128x16xbf16, #tpu.memory_space<vmem>>, vector<128x16xbf16>
    %c0_1 = arith.constant 0 : index
    %c0_2 = arith.constant 0 : index
    %1 = vector.load %arg2[%c0_1, %c0_2] : memref<16x1024xbf16, #tpu.memory_space<vmem>>, vector<16x1024xbf16>
    %cst = arith.constant dense<0.000000e+00> : vector<128x1024xf32>
    %2 = tpu.matmul %0, %1, %cst {dimension_numbers = #tpu.dot_dimension_numbers<[1], [0], [0], [1], [0, 0, 1, 1], [], []>} : vector<128x16xbf16>, vector<16x1024xbf16>, vector<128x1024xf32> -> vector<128x1024xf32>
    %c0_3 = arith.constant 0 : index
    %c0_4 = arith.constant 0 : index
    %3 = vector.load %arg3[%c0_3, %c0_4] : memref<1x1024xf32, #tpu.memory_space<vmem>>, vector<1x1024xf32>
    %4 = vector.broadcast %3 : vector<1x1024xf32> to vector<128x1024xf32>
    %5 = arith.addf %2, %4 : vector<128x1024xf32>
    %6 = arith.truncf %5 : vector<128x1024xf32> to vector<128x1024xbf16>
    %c0_5 = arith.constant 0 : index
    %c0_6 = arith.constant 0 : index
    %7 = vector.load %arg4[%c0_5, %c0_6] : memref<128x1024xbf16, #tpu.memory_space<vmem>>, vector<128x1024xbf16>
    tpu.vector_store %arg4[%c0_5, %c0_6], %6 {strides = array<i32>} : memref<128x1024xbf16, #tpu.memory_space<vmem>>, vector<128x1024xbf16>,
    return
  }
  func.func @transform_0(%arg0: i32) -> (i32, i32) {
    %c0_i32 = arith.constant 0 : i32
    %c0_i32_0 = arith.constant 0 : i32
    return %arg0, %c0_i32 : i32, i32
  }
  func.func @transform_1(%arg0: i32) -> (i32, i32) {
    %c0_i32 = arith.constant 0 : i32
    %c0_i32_0 = arith.constant 0 : i32
    %c0_i32_1 = arith.constant 0 : i32
    return %c0_i32, %c0_i32_0 : i32, i32
  }
  func.func @transform_2(%arg0: i32) -> (i32, i32) {
    %c0_i32 = arith.constant 0 : i32
    %c0_i32_0 = arith.constant 0 : i32
    %c0_i32_1 = arith.constant 0 : i32
    return %c0_i32, %c0_i32_0 : i32, i32
  }
  func.func @transform_3(%arg0: i32) -> (i32, i32) {
    %c0_i32 = arith.constant 0 : i32
    %c0_i32_0 = arith.constant 0 : i32
    return %arg0, %c0_i32 : i32, i32
  }
}

</mosaic_0001>

<bundles_post_ra>
// kernel: tpu_custom_call.1
= control target key start
LH: loop header
LB: loop body
LE: loop exit
PB: predicated region body
PF: predicated region fallthrough
CT: control target
= control target key end

     0   :  { %v1315_v6 = vmov 0   ;;  %vm162_vm0 = vcmask 130048   ;;  %s1630_s0 = inlined_call_operand.vmem [shape: bf16[128,16], index: 0, kind: input, shape index: {}]   ;;  %s1631_s1 = inlined_call_operand.vmem [shape: bf16[16,1024], index: 1, kind: input, shape index: {}]   ;;  %s1632_s2 = inlined_call_operand.vmem [shape: f32[1,1024], index: 2, kind: input, shape index: {}]   ;;  %s1633_s3 = inlined_call_operand.hbm [shape: bf16[128,1024], index: 3, kind: output, shape index: {}]  }
   0x1   :  { %v32_v0 = vld [vmem:[%s1631_s1] sm:$0xff]  ;;  %v33_v2 = vld [vmem:[%s1631_s1 + $0x8] sm:$0xff]  ;;  %219 = vmatprep.mubr.bf16.mxu0 %v1315_v6  ;;  %332 = vmatprep.mubr.bf16.mxu1 %v1315_v6  ;;  %v34_v10 = vld [vmem:[%s1631_s1 + $0x10] sm:$0xff] }
   0x2   :  { %v36_v1 = vld [vmem:[%s1631_s1 + $0x20] sm:$0xff]  ;;  %v37_v4 = vld [vmem:[%s1631_s1 + $0x28] sm:$0xff]  ;;  %v38_v11 = vld [vmem:[%s1631_s1 + $0x30] sm:$0xff] }
   0x3   :  { %v1112_v3 = vcombine.high %v32_v0, %v36_v1  ;;  %v1111_v5 = vcombine.low %v32_v0, %v36_v1  ;;  %v1114_v7 = vcombine.high %v33_v2, %v37_v4  ;;  %v1113_v8 = vcombine.low %v33_v2, %v37_v4  ;;  %v1283_v9 = vld [vmem:[%s1630_s0] sm:$0xff]   ;;  %v35_v13 = vld [vmem:[%s1631_s1 + $0x18] sm:$0xff]  ;;  %v1284_v18 = vld [vmem:[%s1630_s0 + $0x8] sm:$0xff]  }
   0x4   :  { %v1116_v12 = vcombine.high %v34_v10, %v38_v11  ;;  %v39_v14 = vld [vmem:[%s1631_s1 + $0x38] sm:$0xff]  ;;  %v1115_v15 = vcombine.low %v34_v10, %v38_v11 }
   0x5   :  { %187 = vmatprep.subr.bf16.mxu0 %v1112_v3  ;;  %300 = vmatprep.subr.bf16.mxu1 %v1114_v7  ;;  %v1118_v16 = vcombine.high %v35_v13, %v39_v14  ;;  %v1117_v17 = vcombine.low %v35_v13, %v39_v14 }
   0x6   :  { %188 = vmatpush1.bf16.msra.mxu0 %v1111_v5  ;;  %301 = vmatpush1.bf16.msra.mxu1 %v1113_v8 }
   0x7   :  { %413 = vmatprep.subr.bf16.mxu0 %v1116_v12  ;;  %526 = vmatprep.subr.bf16.mxu1 %v1118_v16 }
   0x9   :  { %1119 = vmatmul.mubr.msk.bf16.vlgmr.msra.gmra.mrb[0].mxu0 %vm162_vm0, %v1283_v9  ;;  %1127 = vmatmul.mubr.msk.bf16.vlgmr.msra.gmra.mrb[0].mxu1 %vm162_vm0, %v1283_v9 }
   0xa   :  { %414 = vmatpush1.bf16.msra.mxu0 %v1115_v15  ;;  %527 = vmatpush1.bf16.msra.mxu1 %v1117_v17 }
   0xb   :  { %229 = vmatprep.mubr.bf16.mxu0 %v1315_v6  ;;  %342 = vmatprep.mubr.bf16.mxu1 %v1315_v6 }
   0xc   :  { %8 = vsyncpa [#allocation3], 0  ;;  %v1285_v19 = vld [vmem:[%s1630_s0 + $0x10] sm:$0xff]   ;;  %v1286_v20 = vld [vmem:[%s1630_s0 + $0x18] sm:$0xff]   ;;  %v42_v25 = vlaneseq }
   0xd   :  { %v1287_v21 = vld [vmem:[%s1630_s0 + $0x20] sm:$0xff]   ;;  %v1288_v22 = vld [vmem:[%s1630_s0 + $0x28] sm:$0xff]   ;;  %v1289_v23 = vld [vmem:[%s1630_s0 + $0x30] sm:$0xff]  }
   0xe   :  { %v1290_v24 = vld [vmem:[%s1630_s0 + $0x38] sm:$0xff]   ;;  %v1451_v26 = vshrl.u32 %v42_v25, 7  ;;  %v1457_v28 = vld [vmem:[%s1632_s2] sm:$0xff]  ;;  %s1316_s2 = smov [#allocation2]  }
   0xf   :  { %s1092_s17 = sshll.u32 %s1316_s2, 4  ;;  %s1093_s17 = int_to_ptr.vmem [resolvable:$true] %s1092_s17 }
  0x10   :  { %v44_v27 = vsub.s32 0, %v1451_v26  ;;  %v52_v29 = vsub.s32 2, %v1451_v26  ;;  %v48_v30 = vsub.s32 1, %v1451_v26  ;;  %v56_v31 = vsub.s32 3, %v1451_v26  ;;  %s1291_s18 = scalar_lea.vmem %s1093_s17, 8192  ;;  %p1296_p1 = scmp.lt.s32.totalorder %s1093_s17, %s1093_s17 }
  0x11   :  { %1120 = vmatmul.mubr.msk.bf16.gmra.mrb[4].mxu0 %vm162_vm0, %v1284_v18  ;;  %1128 = vmatmul.mubr.msk.bf16.gmra.mrb[4].mxu1 %vm162_vm0, %v1284_v18  ;;  %p1292_p0 = scmp.ne.s32.totalorder %s1093_s17, %s1291_s18  ;;  %p1297_p2 = scmp.lt.s32.totalorder %s1291_s18, %s1291_s18 }
  0x12   :  { %239 = vmatprep.mubr.bf16.mxu0 %v1315_v6  ;;  %352 = vmatprep.mubr.bf16.mxu1 %v1315_v6  ;;  %v1463_v32 = vrot.slane %v1457_v28, %v44_v27  ;;  %v1466_v33 = vrot.slane %v1457_v28, %v52_v29  ;;  %v1469_v34 = vrot.slane %v1457_v28, %v48_v30 }
  0x13   :  { %v1472_v35 = vrot.slane %v1457_v28, %v56_v31  ;;  %p1298_p3 = por %p1297_p2, %p1296_p1 }
  0x15   :  { %p1299_p4 = pnand %p1298_p3, %p1292_p0 }
  0x19   :  { %1121 = vmatmul.mubr.msk.bf16.gmra.mrb[8].mxu0 %vm162_vm0, %v1285_v19  ;;  %1129 = vmatmul.mubr.msk.bf16.gmra.mrb[8].mxu1 %vm162_vm0, %v1285_v19 }
  0x1a   :  { %249 = vmatprep.mubr.bf16.mxu0 %v1315_v6  ;;  %362 = vmatprep.mubr.bf16.mxu1 %v1315_v6 }
  0x21   :  { %1122 = vmatmul.mubr.msk.bf16.gmra.mrb[12].mxu0 %vm162_vm0, %v1286_v20  ;;  %1130 = vmatmul.mubr.msk.bf16.gmra.mrb[12].mxu1 %vm162_vm0, %v1286_v20 }
  0x22   :  { %259 = vmatprep.mubr.bf16.mxu0 %v1315_v6  ;;  %372 = vmatprep.mubr.bf16.mxu1 %v1315_v6 }
  0x29   :  { %1123 = vmatmul.mubr.msk.bf16.gmra.mrb[16].mxu0 %vm162_vm0, %v1287_v21  ;;  %1131 = vmatmul.mubr.msk.bf16.gmra.mrb[16].mxu1 %vm162_vm0, %v1287_v21 }
  0x2a   :  { %269 = vmatprep.mubr.bf16.mxu0 %v1315_v6  ;;  %382 = vmatprep.mubr.bf16.mxu1 %v1315_v6 }
  0x31   :  { %1124 = vmatmul.mubr.msk.bf16.gmra.mrb[20].mxu0 %vm162_vm0, %v1288_v22  ;;  %1132 = vmatmul.mubr.msk.bf16.gmra.mrb[20].mxu1 %vm162_vm0, %v1288_v22 }
  0x32   :  { %279 = vmatprep.mubr.bf16.mxu0 %v1315_v6  ;;  %392 = vmatprep.mubr.bf16.mxu1 %v1315_v6 }
  0x39   :  { %1125 = vmatmul.mubr.msk.bf16.gmra.mrb[24].mxu0 %vm162_vm0, %v1289_v23  ;;  %1133 = vmatmul.mubr.msk.bf16.gmra.mrb[24].mxu1 %vm162_vm0, %v1289_v23 }
  0x3a   :  { %289 = vmatprep.mubr.bf16.mxu0 %v1315_v6  ;;  %402 = vmatprep.mubr.bf16.mxu1 %v1315_v6 }
  0x41   :  { %1126 = vmatmul.mubr.msk.bf16.gmra.mrb[28].mxu0 %vm162_vm0, %v1290_v24  ;;  %1134 = vmatmul.mubr.msk.bf16.gmra.mrb[28].mxu1 %vm162_vm0, %v1290_v24 }
  0x42   :  { %445 = vmatprep.mubr.bf16.mxu0 %v1315_v6  ;;  %558 = vmatprep.mubr.bf16.mxu1 %v1315_v6 }
  0x49   :  { %1135 = vmatmul.mubr.msk.bf16.vlgmr.msra.gmra.mrb[32].mxu0 %vm162_vm0, %v1283_v9  ;;  %1143 = vmatmul.mubr.msk.bf16.vlgmr.msra.gmra.mrb[32].mxu1 %vm162_vm0, %v1283_v9 }
  0x4a   :  { %455 = vmatprep.mubr.bf16.mxu0 %v1315_v6  ;;  %568 = vmatprep.mubr.bf16.mxu1 %v1315_v6 }
  0x51   :  { %1136 = vmatmul.mubr.msk.bf16.gmra.mrb[36].mxu0 %vm162_vm0, %v1284_v18  ;;  %1144 = vmatmul.mubr.msk.bf16.gmra.mrb[36].mxu1 %vm162_vm0, %v1284_v18 }
  0x52   :  { %465 = vmatprep.mubr.bf16.mxu0 %v1315_v6  ;;  %578 = vmatprep.mubr.bf16.mxu1 %v1315_v6 }
  0x59   :  { %1137 = vmatmul.mubr.msk.bf16.gmra.mrb[40].mxu0 %vm162_vm0, %v1285_v19  ;;  %1145 = vmatmul.mubr.msk.bf16.gmra.mrb[40].mxu1 %vm162_vm0, %v1285_v19 }
  0x5a   :  { %475 = vmatprep.mubr.bf16.mxu0 %v1315_v6  ;;  %588 = vmatprep.mubr.bf16.mxu1 %v1315_v6 }
  0x61   :  { %1138 = vmatmul.mubr.msk.bf16.gmra.mrb[44].mxu0 %vm162_vm0, %v1286_v20  ;;  %1146 = vmatmul.mubr.msk.bf16.gmra.mrb[44].mxu1 %vm162_vm0, %v1286_v20 }
  0x62   :  { %485 = vmatprep.mubr.bf16.mxu0 %v1315_v6  ;;  %598 = vmatprep.mubr.bf16.mxu1 %v1315_v6 }
  0x69   :  { %1139 = vmatmul.mubr.msk.bf16.gmra.mrb[48].mxu0 %vm162_vm0, %v1287_v21  ;;  %1147 = vmatmul.mubr.msk.bf16.gmra.mrb[48].mxu1 %vm162_vm0, %v1287_v21 }
  0x6a   :  { %495 = vmatprep.mubr.bf16.mxu0 %v1315_v6  ;;  %608 = vmatprep.mubr.bf16.mxu1 %v1315_v6 }
  0x71   :  { %1140 = vmatmul.mubr.msk.bf16.gmra.mrb[52].mxu0 %vm162_vm0, %v1288_v22  ;;  %1148 = vmatmul.mubr.msk.bf16.gmra.mrb[52].mxu1 %vm162_vm0, %v1288_v22 }
  0x72   :  { %505 = vmatprep.mubr.bf16.mxu0 %v1315_v6  ;;  %618 = vmatprep.mubr.bf16.mxu1 %v1315_v6 }
  0x79   :  { %1141 = vmatmul.mubr.msk.bf16.gmra.mrb[56].mxu0 %vm162_vm0, %v1289_v23  ;;  %1149 = vmatmul.mubr.msk.bf16.gmra.mrb[56].mxu1 %vm162_vm0, %v1289_v23 }
  0x7a   :  { %515 = vmatprep.mubr.bf16.mxu0 %v1315_v6  ;;  %628 = vmatprep.mubr.bf16.mxu1 %v1315_v6 }
  0x81   :  { %1142 = vmatmul.mubr.msk.bf16.gmra.mrb[60].mxu0 %vm162_vm0, %v1290_v24  ;;  %1150 = vmatmul.mubr.msk.bf16.gmra.mrb[60].mxu1 %vm162_vm0, %v1290_v24 }
  0xdc   :  { %v221_v36 = vpop.f32.mrb[0].mxu0  ;;  %v334_v38 = vpop.f32.mrb[0].mxu1 }
  0xdd   :  { %v222_v37 = vadd.f32 %v221_v36, %v1463_v32  ;;  %v223_v39 = vpop.f32.mrb[1].mxu0  ;;  %v335_v40 = vadd.f32 %v334_v38, %v1466_v33  ;;  %v336_v42 = vpop.f32.mrb[1].mxu1 }
  0xde   :  { %v224_v41 = vadd.f32 %v223_v39, %v1469_v34  ;;  %v225_v43 = vpop.f32.mrb[2].mxu0  ;;  %v337_v44 = vadd.f32 %v336_v42, %v1472_v35  ;;  %v338_v46 = vpop.f32.mrb[2].mxu1 }
  0xdf   :  { %v226_v45 = vadd.f32 %v225_v43, %v1463_v32  ;;  %v227_v47 = vpop.f32.mrb[3].mxu0  ;;  %v339_v49 = vadd.f32 %v338_v46, %v1466_v33  ;;  %v340_v51 = vpop.f32.mrb[3].mxu1 }
  0xe0   :  { %v1215_v48 = vpack.c.bf16 %v224_v41, %v222_v37  ;;  %v228_v50 = vadd.f32 %v227_v47, %v1469_v34  ;;  %v1216_v52 = vpack.c.bf16 %v337_v44, %v335_v40  ;;  %v341_v53 = vadd.f32 %v340_v51, %v1472_v35 }
  0xe2   :  { %1023 = vst [vmem:[#allocation2] sm:$0xff] %v1215_v48  ;;  %v1219_v54 = vpack.c.bf16 %v228_v50, %v226_v45  ;;  %1024 = vst [vmem:[#allocation2 + $0x8] sm:$0xff] %v1216_v52  ;;  %v1220_v55 = vpack.c.bf16 %v341_v53, %v339_v49 }
  0xe4   :  { %1027 = vst [vmem:[#allocation2 + $0x20] sm:$0xff] %v1219_v54  ;;  %v231_v56 = vpop.f32.mrb[4].mxu0  ;;  %1028 = vst [vmem:[#allocation2 + $0x28] sm:$0xff] %v1220_v55  ;;  %v344_v58 = vpop.f32.mrb[4].mxu1 }
  0xe5   :  { %v232_v57 = vadd.f32 %v231_v56, %v1463_v32  ;;  %v233_v59 = vpop.f32.mrb[5].mxu0  ;;  %v345_v60 = vadd.f32 %v344_v58, %v1466_v33  ;;  %v346_v62 = vpop.f32.mrb[5].mxu1 }
  0xe6   :  { %v234_v61 = vadd.f32 %v233_v59, %v1469_v34  ;;  %v235_v63 = vpop.f32.mrb[6].mxu0  ;;  %v347_v0 = vadd.f32 %v346_v62, %v1472_v35  ;;  %v348_v2 = vpop.f32.mrb[6].mxu1 }
  0xe7   :  { %v236_v1 = vadd.f32 %v235_v63, %v1463_v32  ;;  %v237_v3 = vpop.f32.mrb[7].mxu0  ;;  %v349_v5 = vadd.f32 %v348_v2, %v1466_v33  ;;  %v350_v7 = vpop.f32.mrb[7].mxu1 }
  0xe8   :  { %v1223_v4 = vpack.c.bf16 %v234_v61, %v232_v57  ;;  %v238_v6 = vadd.f32 %v237_v3, %v1469_v34  ;;  %v1224_v8 = vpack.c.bf16 %v347_v0, %v345_v60  ;;  %v351_v9 = vadd.f32 %v350_v7, %v1472_v35 }
  0xea   :  { %1031 = vst [vmem:[#allocation2 + $0x40] sm:$0xff] %v1223_v4  ;;  %v1227_v10 = vpack.c.bf16 %v238_v6, %v236_v1  ;;  %1032 = vst [vmem:[#allocation2 + $0x48] sm:$0xff] %v1224_v8  ;;  %v1228_v11 = vpack.c.bf16 %v351_v9, %v349_v5 }
  0xec   :  { %1035 = vst [vmem:[#allocation2 + $0x60] sm:$0xff] %v1227_v10  ;;  %v241_v12 = vpop.f32.mrb[8].mxu0  ;;  %1036 = vst [vmem:[#allocation2 + $0x68] sm:$0xff] %v1228_v11  ;;  %v354_v14 = vpop.f32.mrb[8].mxu1 }
  0xed   :  { %v242_v13 = vadd.f32 %v241_v12, %v1463_v32  ;;  %v243_v15 = vpop.f32.mrb[9].mxu0  ;;  %v355_v16 = vadd.f32 %v354_v14, %v1466_v33  ;;  %v356_v18 = vpop.f32.mrb[9].mxu1 }
  0xee   :  { %v244_v17 = vadd.f32 %v243_v15, %v1469_v34  ;;  %v245_v19 = vpop.f32.mrb[10].mxu0  ;;  %v357_v20 = vadd.f32 %v356_v18, %v1472_v35  ;;  %v358_v22 = vpop.f32.mrb[10].mxu1 }
  0xef   :  { %v246_v21 = vadd.f32 %v245_v19, %v1463_v32  ;;  %v247_v23 = vpop.f32.mrb[11].mxu0  ;;  %v359_v25 = vadd.f32 %v358_v22, %v1466_v33  ;;  %v360_v29 = vpop.f32.mrb[11].mxu1 }
  0xf0   :  { %v1231_v24 = vpack.c.bf16 %v244_v17, %v242_v13  ;;  %v248_v27 = vadd.f32 %v247_v23, %v1469_v34  ;;  %v1232_v30 = vpack.c.bf16 %v357_v20, %v355_v16  ;;  %v361_v31 = vadd.f32 %v360_v29, %v1472_v35 }
  0xf2   :  { %1039 = vst [vmem:[#allocation2 + $0x80] sm:$0xff] %v1231_v24  ;;  %v1235_v36 = vpack.c.bf16 %v248_v27, %v246_v21  ;;  %1040 = vst [vmem:[#allocation2 + $0x88] sm:$0xff] %v1232_v30  ;;  %v1236_v37 = vpack.c.bf16 %v361_v31, %v359_v25 }
  0xf4   :  { %1043 = vst [vmem:[#allocation2 + $0xa0] sm:$0xff] %v1235_v36  ;;  %v251_v38 = vpop.f32.mrb[12].mxu0  ;;  %1044 = vst [vmem:[#allocation2 + $0xa8] sm:$0xff] %v1236_v37  ;;  %v364_v40 = vpop.f32.mrb[12].mxu1 }
  0xf5   :  { %v252_v39 = vadd.f32 %v251_v38, %v1463_v32  ;;  %v253_v41 = vpop.f32.mrb[13].mxu0  ;;  %v365_v42 = vadd.f32 %v364_v40, %v1466_v33  ;;  %v366_v44 = vpop.f32.mrb[13].mxu1 }
  0xf6   :  { %v254_v43 = vadd.f32 %v253_v41, %v1469_v34  ;;  %v255_v45 = vpop.f32.mrb[14].mxu0  ;;  %v367_v46 = vadd.f32 %v366_v44, %v1472_v35  ;;  %v368_v48 = vpop.f32.mrb[14].mxu1 }
  0xf7   :  { %v256_v47 = vadd.f32 %v255_v45, %v1463_v32  ;;  %v257_v49 = vpop.f32.mrb[15].mxu0  ;;  %v369_v51 = vadd.f32 %v368_v48, %v1466_v33  ;;  %v370_v53 = vpop.f32.mrb[15].mxu1 }
  0xf8   :  { %v1239_v50 = vpack.c.bf16 %v254_v43, %v252_v39  ;;  %v258_v52 = vadd.f32 %v257_v49, %v1469_v34  ;;  %v1240_v54 = vpack.c.bf16 %v367_v46, %v365_v42  ;;  %v371_v55 = vadd.f32 %v370_v53, %v1472_v35 }
  0xfa   :  { %1047 = vst [vmem:[#allocation2 + $0xc0] sm:$0xff] %v1239_v50  ;;  %v1243_v56 = vpack.c.bf16 %v258_v52, %v256_v47  ;;  %1048 = vst [vmem:[#allocation2 + $0xc8] sm:$0xff] %v1240_v54  ;;  %v1244_v57 = vpack.c.bf16 %v371_v55, %v369_v51 }
  0xfc   :  { %1051 = vst [vmem:[#allocation2 + $0xe0] sm:$0xff] %v1243_v56  ;;  %v261_v58 = vpop.f32.mrb[16].mxu0  ;;  %1052 = vst [vmem:[#allocation2 + $0xe8] sm:$0xff] %v1244_v57  ;;  %v374_v60 = vpop.f32.mrb[16].mxu1 }
  0xfd   :  { %v262_v59 = vadd.f32 %v261_v58, %v1463_v32  ;;  %v263_v61 = vpop.f32.mrb[17].mxu0  ;;  %v375_v62 = vadd.f32 %v374_v60, %v1466_v33  ;;  %v376_v0 = vpop.f32.mrb[17].mxu1 }
  0xfe   :  { %v264_v63 = vadd.f32 %v263_v61, %v1469_v34  ;;  %v265_v1 = vpop.f32.mrb[18].mxu0  ;;  %v377_v2 = vadd.f32 %v376_v0, %v1472_v35  ;;  %v378_v4 = vpop.f32.mrb[18].mxu1  ;;  %v60_v0 = vsub.s32 4, %v1451_v26 }
  0xff   :  { %v266_v3 = vadd.f32 %v265_v1, %v1463_v32  ;;  %v267_v5 = vpop.f32.mrb[19].mxu0  ;;  %v379_v7 = vadd.f32 %v378_v4, %v1466_v33  ;;  %v380_v9 = vpop.f32.mrb[19].mxu1 }
 0x100   :  { %v1247_v6 = vpack.c.bf16 %v264_v63, %v262_v59  ;;  %v268_v8 = vadd.f32 %v267_v5, %v1469_v34  ;;  %v1248_v10 = vpack.c.bf16 %v377_v2, %v375_v62  ;;  %v381_v11 = vadd.f32 %v380_v9, %v1472_v35 }
 0x101   :  { %v68_v5 = vsub.s32 6, %v1451_v26 }
 0x102   :  { %1055 = vst [vmem:[#allocation2 + $0x100] sm:$0xff] %v1247_v6  ;;  %v1251_v12 = vpack.c.bf16 %v268_v8, %v266_v3  ;;  %1056 = vst [vmem:[#allocation2 + $0x108] sm:$0xff] %v1248_v10  ;;  %v1252_v13 = vpack.c.bf16 %v381_v11, %v379_v7  ;;  %v64_v6 = vsub.s32 5, %v1451_v26  ;;  %v72_v11 = vsub.s32 7, %v1451_v26 }
 0x104   :  { %1059 = vst [vmem:[#allocation2 + $0x120] sm:$0xff] %v1251_v12  ;;  %v271_v14 = vpop.f32.mrb[20].mxu0  ;;  %1060 = vst [vmem:[#allocation2 + $0x128] sm:$0xff] %v1252_v13  ;;  %v384_v16 = vpop.f32.mrb[20].mxu1 }
 0x105   :  { %v272_v15 = vadd.f32 %v271_v14, %v1463_v32  ;;  %v273_v17 = vpop.f32.mrb[21].mxu0  ;;  %v385_v18 = vadd.f32 %v384_v16, %v1466_v33  ;;  %v386_v20 = vpop.f32.mrb[21].mxu1 }
 0x106   :  { %v274_v19 = vadd.f32 %v273_v17, %v1469_v34  ;;  %v275_v21 = vpop.f32.mrb[22].mxu0  ;;  %v387_v22 = vadd.f32 %v386_v20, %v1472_v35  ;;  %v388_v24 = vpop.f32.mrb[22].mxu1  ;;  %v1549_v20 = vrot.slane %v1457_v28, %v64_v6 }
 0x107   :  { %v276_v23 = vadd.f32 %v275_v21, %v1463_v32  ;;  %v277_v25 = vpop.f32.mrb[23].mxu0  ;;  %v389_v29 = vadd.f32 %v388_v24, %v1466_v33  ;;  %v390_v31 = vpop.f32.mrb[23].mxu1 }
 0x108   :  { %v1255_v27 = vpack.c.bf16 %v274_v19, %v272_v15  ;;  %v278_v30 = vadd.f32 %v277_v25, %v1469_v34  ;;  %v1256_v36 = vpack.c.bf16 %v387_v22, %v385_v18  ;;  %v391_v37 = vadd.f32 %v390_v31, %v1472_v35 }
 0x109   :  { %v1543_v18 = vrot.slane %v1457_v28, %v60_v0 }
 0x10a   :  { %1063 = vst [vmem:[#allocation2 + $0x140] sm:$0xff] %v1255_v27  ;;  %v1259_v38 = vpack.c.bf16 %v278_v30, %v276_v23  ;;  %1064 = vst [vmem:[#allocation2 + $0x148] sm:$0xff] %v1256_v36  ;;  %v1260_v39 = vpack.c.bf16 %v391_v37, %v389_v29 }
 0x10c   :  { %1067 = vst [vmem:[#allocation2 + $0x160] sm:$0xff] %v1259_v38  ;;  %v281_v40 = vpop.f32.mrb[24].mxu0  ;;  %1068 = vst [vmem:[#allocation2 + $0x168] sm:$0xff] %v1260_v39  ;;  %v394_v42 = vpop.f32.mrb[24].mxu1 }
 0x10d   :  { %v282_v41 = vadd.f32 %v281_v40, %v1463_v32  ;;  %v283_v43 = vpop.f32.mrb[25].mxu0  ;;  %v395_v44 = vadd.f32 %v394_v42, %v1466_v33  ;;  %v396_v46 = vpop.f32.mrb[25].mxu1 }
 0x10e   :  { %v284_v45 = vadd.f32 %v283_v43, %v1469_v34  ;;  %v285_v47 = vpop.f32.mrb[26].mxu0  ;;  %v397_v48 = vadd.f32 %v396_v46, %v1472_v35  ;;  %v398_v50 = vpop.f32.mrb[26].mxu1 }
 0x10f   :  { %v286_v49 = vadd.f32 %v285_v47, %v1463_v32  ;;  %v287_v51 = vpop.f32.mrb[27].mxu0  ;;  %v399_v53 = vadd.f32 %v398_v50, %v1466_v33  ;;  %v400_v55 = vpop.f32.mrb[27].mxu1 }
 0x110   :  { %v1263_v52 = vpack.c.bf16 %v284_v45, %v282_v41  ;;  %v288_v54 = vadd.f32 %v287_v51, %v1469_v34  ;;  %v1264_v56 = vpack.c.bf16 %v397_v48, %v395_v44  ;;  %v401_v57 = vadd.f32 %v400_v55, %v1472_v35 }
 0x112   :  { %1071 = vst [vmem:[#allocation2 + $0x180] sm:$0xff] %v1263_v52  ;;  %v1267_v58 = vpack.c.bf16 %v288_v54, %v286_v49  ;;  %1072 = vst [vmem:[#allocation2 + $0x188] sm:$0xff] %v1264_v56  ;;  %v1268_v59 = vpack.c.bf16 %v401_v57, %v399_v53 }
 0x114   :  { %1075 = vst [vmem:[#allocation2 + $0x1a0] sm:$0xff] %v1267_v58  ;;  %v291_v60 = vpop.f32.mrb[28].mxu0  ;;  %1076 = vst [vmem:[#allocation2 + $0x1a8] sm:$0xff] %v1268_v59  ;;  %v404_v62 = vpop.f32.mrb[28].mxu1 }
 0x115   :  { %v292_v61 = vadd.f32 %v291_v60, %v1463_v32  ;;  %v293_v63 = vpop.f32.mrb[29].mxu0  ;;  %v405_v1 = vadd.f32 %v404_v62, %v1466_v33  ;;  %v406_v3 = vpop.f32.mrb[29].mxu1 }
 0x116   :  { %v294_v2 = vadd.f32 %v293_v63, %v1469_v34  ;;  %v295_v4 = vpop.f32.mrb[30].mxu0  ;;  %v407_v7 = vadd.f32 %v406_v3, %v1472_v35  ;;  %v408_v9 = vpop.f32.mrb[30].mxu1 }
 0x117   :  { %v296_v8 = vadd.f32 %v295_v4, %v1463_v32  ;;  %v297_v10 = vpop.f32.mrb[31].mxu0  ;;  %v409_v13 = vadd.f32 %v408_v9, %v1466_v33  ;;  %v410_v15 = vpop.f32.mrb[31].mxu1  ;;  %v1546_v32 = vrot.slane %v1457_v28, %v68_v5  ;;  %v1552_v33 = vrot.slane %v1457_v28, %v72_v11 }
 0x118   :  { %v1271_v12 = vpack.c.bf16 %v294_v2, %v292_v61  ;;  %v298_v14 = vadd.f32 %v297_v10, %v1469_v34  ;;  %v1272_v16 = vpack.c.bf16 %v407_v7, %v405_v1  ;;  %v411_v17 = vadd.f32 %v410_v15, %v1472_v35 }
 0x11a   :  { %1079 = vst [vmem:[#allocation2 + $0x1c0] sm:$0xff] %v1271_v12  ;;  %v1275_v19 = vpack.c.bf16 %v298_v14, %v296_v8  ;;  %1080 = vst [vmem:[#allocation2 + $0x1c8] sm:$0xff] %v1272_v16  ;;  %v1276_v26 = vpack.c.bf16 %v411_v17, %v409_v13 }
 0x11c   :  { %1083 = vst [vmem:[#allocation2 + $0x1e0] sm:$0xff] %v1275_v19  ;;  %v447_v34 = vpop.f32.mrb[32].mxu0  ;;  %1084 = vst [vmem:[#allocation2 + $0x1e8] sm:$0xff] %v1276_v26  ;;  %v560_v21 = vpop.f32.mrb[32].mxu1 }
 0x11d   :  { %v448_v35 = vadd.f32 %v447_v34, %v1543_v18  ;;  %v449_v22 = vpop.f32.mrb[33].mxu0  ;;  %v561_v23 = vadd.f32 %v560_v21, %v1546_v32  ;;  %v562_v25 = vpop.f32.mrb[33].mxu1 }
 0x11e   :  { %v450_v24 = vadd.f32 %v449_v22, %v1549_v20  ;;  %v451_v27 = vpop.f32.mrb[34].mxu0  ;;  %v563_v29 = vadd.f32 %v562_v25, %v1552_v33  ;;  %v564_v31 = vpop.f32.mrb[34].mxu1 }
 0x11f   :  { %v452_v30 = vadd.f32 %v451_v27, %v1543_v18  ;;  %v453_v28 = vpop.f32.mrb[35].mxu0  ;;  %v565_v37 = vadd.f32 %v564_v31, %v1546_v32  ;;  %v566_v39 = vpop.f32.mrb[35].mxu1 }
 0x120   :  { %v1217_v36 = vpack.c.bf16 %v450_v24, %v448_v35  ;;  %v454_v38 = vadd.f32 %v453_v28, %v1549_v20  ;;  %v1218_v40 = vpack.c.bf16 %v563_v29, %v561_v23  ;;  %v567_v41 = vadd.f32 %v566_v39, %v1552_v33 }
 0x122   :  { %1025 = vst [vmem:[#allocation2 + $0x10] sm:$0xff] %v1217_v36  ;;  %v1221_v42 = vpack.c.bf16 %v454_v38, %v452_v30  ;;  %1026 = vst [vmem:[#allocation2 + $0x18] sm:$0xff] %v1218_v40  ;;  %v1222_v43 = vpack.c.bf16 %v567_v41, %v565_v37 }
 0x124   :  { %1029 = vst [vmem:[#allocation2 + $0x30] sm:$0xff] %v1221_v42  ;;  %v457_v44 = vpop.f32.mrb[36].mxu0  ;;  %1030 = vst [vmem:[#allocation2 + $0x38] sm:$0xff] %v1222_v43  ;;  %v570_v46 = vpop.f32.mrb[36].mxu1 }
 0x125   :  { %v458_v45 = vadd.f32 %v457_v44, %v1543_v18  ;;  %v459_v47 = vpop.f32.mrb[37].mxu0  ;;  %v571_v48 = vadd.f32 %v570_v46, %v1546_v32  ;;  %v572_v50 = vpop.f32.mrb[37].mxu1 }
 0x126   :  { %v460_v49 = vadd.f32 %v459_v47, %v1549_v20  ;;  %v461_v51 = vpop.f32.mrb[38].mxu0  ;;  %v573_v52 = vadd.f32 %v572_v50, %v1552_v33  ;;  %v574_v54 = vpop.f32.mrb[38].mxu1 }
 0x127   :  { %v462_v53 = vadd.f32 %v461_v51, %v1543_v18  ;;  %v463_v55 = vpop.f32.mrb[39].mxu0  ;;  %v575_v57 = vadd.f32 %v574_v54, %v1546_v32  ;;  %v576_v59 = vpop.f32.mrb[39].mxu1 }
 0x128   :  { %v1225_v56 = vpack.c.bf16 %v460_v49, %v458_v45  ;;  %v464_v58 = vadd.f32 %v463_v55, %v1549_v20  ;;  %v1226_v60 = vpack.c.bf16 %v573_v52, %v571_v48  ;;  %v577_v61 = vadd.f32 %v576_v59, %v1552_v33 }
 0x12a   :  { %1033 = vst [vmem:[#allocation2 + $0x50] sm:$0xff] %v1225_v56  ;;  %v1229_v62 = vpack.c.bf16 %v464_v58, %v462_v53  ;;  %1034 = vst [vmem:[#allocation2 + $0x58] sm:$0xff] %v1226_v60  ;;  %v1230_v63 = vpack.c.bf16 %v577_v61, %v575_v57 }
 0x12c   :  { %1037 = vst [vmem:[#allocation2 + $0x70] sm:$0xff] %v1229_v62  ;;  %v467_v0 = vpop.f32.mrb[40].mxu0  ;;  %1038 = vst [vmem:[#allocation2 + $0x78] sm:$0xff] %v1230_v63  ;;  %v580_v2 = vpop.f32.mrb[40].mxu1 }
 0x12d   :  { %v468_v1 = vadd.f32 %v467_v0, %v1543_v18  ;;  %v469_v3 = vpop.f32.mrb[41].mxu0  ;;  %v581_v4 = vadd.f32 %v580_v2, %v1546_v32  ;;  %v582_v6 = vpop.f32.mrb[41].mxu1 }
 0x12e   :  { %v470_v5 = vadd.f32 %v469_v3, %v1549_v20  ;;  %v471_v7 = vpop.f32.mrb[42].mxu0  ;;  %v583_v8 = vadd.f32 %v582_v6, %v1552_v33  ;;  %v584_v10 = vpop.f32.mrb[42].mxu1 }
 0x12f   :  { %v472_v9 = vadd.f32 %v471_v7, %v1543_v18  ;;  %v473_v11 = vpop.f32.mrb[43].mxu0  ;;  %v585_v13 = vadd.f32 %v584_v10, %v1546_v32  ;;  %v586_v15 = vpop.f32.mrb[43].mxu1 }
 0x130   :  { %v1233_v12 = vpack.c.bf16 %v470_v5, %v468_v1  ;;  %v474_v14 = vadd.f32 %v473_v11, %v1549_v20  ;;  %v1234_v16 = vpack.c.bf16 %v583_v8, %v581_v4  ;;  %v587_v17 = vadd.f32 %v586_v15, %v1552_v33 }
 0x132   :  { %1041 = vst [vmem:[#allocation2 + $0x90] sm:$0xff] %v1233_v12  ;;  %v1237_v19 = vpack.c.bf16 %v474_v14, %v472_v9  ;;  %1042 = vst [vmem:[#allocation2 + $0x98] sm:$0xff] %v1234_v16  ;;  %v1238_v26 = vpack.c.bf16 %v587_v17, %v585_v13 }
 0x134   :  { %1045 = vst [vmem:[#allocation2 + $0xb0] sm:$0xff] %v1237_v19  ;;  %v477_v34 = vpop.f32.mrb[44].mxu0  ;;  %1046 = vst [vmem:[#allocation2 + $0xb8] sm:$0xff] %v1238_v26  ;;  %v590_v21 = vpop.f32.mrb[44].mxu1 }
 0x135   :  { %v478_v35 = vadd.f32 %v477_v34, %v1543_v18  ;;  %v479_v22 = vpop.f32.mrb[45].mxu0  ;;  %v591_v23 = vadd.f32 %v590_v21, %v1546_v32  ;;  %v592_v25 = vpop.f32.mrb[45].mxu1 }
 0x136   :  { %v480_v24 = vadd.f32 %v479_v22, %v1549_v20  ;;  %v481_v27 = vpop.f32.mrb[46].mxu0  ;;  %v593_v29 = vadd.f32 %v592_v25, %v1552_v33  ;;  %v594_v31 = vpop.f32.mrb[46].mxu1 }
 0x137   :  { %v482_v30 = vadd.f32 %v481_v27, %v1543_v18  ;;  %v483_v28 = vpop.f32.mrb[47].mxu0  ;;  %v595_v37 = vadd.f32 %v594_v31, %v1546_v32  ;;  %v596_v39 = vpop.f32.mrb[47].mxu1 }
 0x138   :  { %v1241_v36 = vpack.c.bf16 %v480_v24, %v478_v35  ;;  %v484_v38 = vadd.f32 %v483_v28, %v1549_v20  ;;  %v1242_v40 = vpack.c.bf16 %v593_v29, %v591_v23  ;;  %v597_v41 = vadd.f32 %v596_v39, %v1552_v33 }
 0x13a   :  { %1049 = vst [vmem:[#allocation2 + $0xd0] sm:$0xff] %v1241_v36  ;;  %v1245_v42 = vpack.c.bf16 %v484_v38, %v482_v30  ;;  %1050 = vst [vmem:[#allocation2 + $0xd8] sm:$0xff] %v1242_v40  ;;  %v1246_v43 = vpack.c.bf16 %v597_v41, %v595_v37 }
 0x13c   :  { %1053 = vst [vmem:[#allocation2 + $0xf0] sm:$0xff] %v1245_v42  ;;  %v487_v44 = vpop.f32.mrb[48].mxu0  ;;  %1054 = vst [vmem:[#allocation2 + $0xf8] sm:$0xff] %v1246_v43  ;;  %v600_v46 = vpop.f32.mrb[48].mxu1 }
 0x13d   :  { %v488_v45 = vadd.f32 %v487_v44, %v1543_v18  ;;  %v489_v47 = vpop.f32.mrb[49].mxu0  ;;  %v601_v48 = vadd.f32 %v600_v46, %v1546_v32  ;;  %v602_v50 = vpop.f32.mrb[49].mxu1 }
 0x13e   :  { %v490_v49 = vadd.f32 %v489_v47, %v1549_v20  ;;  %v491_v51 = vpop.f32.mrb[50].mxu0  ;;  %v603_v52 = vadd.f32 %v602_v50, %v1552_v33  ;;  %v604_v54 = vpop.f32.mrb[50].mxu1 }
 0x13f   :  { %v492_v53 = vadd.f32 %v491_v51, %v1543_v18  ;;  %v493_v55 = vpop.f32.mrb[51].mxu0  ;;  %v605_v57 = vadd.f32 %v604_v54, %v1546_v32  ;;  %v606_v59 = vpop.f32.mrb[51].mxu1 }
 0x140   :  { %v1249_v56 = vpack.c.bf16 %v490_v49, %v488_v45  ;;  %v494_v58 = vadd.f32 %v493_v55, %v1549_v20  ;;  %v1250_v60 = vpack.c.bf16 %v603_v52, %v601_v48  ;;  %v607_v61 = vadd.f32 %v606_v59, %v1552_v33 }
 0x142   :  { %1057 = vst [vmem:[#allocation2 + $0x110] sm:$0xff] %v1249_v56  ;;  %v1253_v62 = vpack.c.bf16 %v494_v58, %v492_v53  ;;  %1058 = vst [vmem:[#allocation2 + $0x118] sm:$0xff] %v1250_v60  ;;  %v1254_v63 = vpack.c.bf16 %v607_v61, %v605_v57 }
 0x144   :  { %1061 = vst [vmem:[#allocation2 + $0x130] sm:$0xff] %v1253_v62  ;;  %v497_v0 = vpop.f32.mrb[52].mxu0  ;;  %1062 = vst [vmem:[#allocation2 + $0x138] sm:$0xff] %v1254_v63  ;;  %v610_v2 = vpop.f32.mrb[52].mxu1 }
 0x145   :  { %v498_v1 = vadd.f32 %v497_v0, %v1543_v18  ;;  %v499_v3 = vpop.f32.mrb[53].mxu0  ;;  %v611_v4 = vadd.f32 %v610_v2, %v1546_v32  ;;  %v612_v6 = vpop.f32.mrb[53].mxu1 }
 0x146   :  { %v500_v5 = vadd.f32 %v499_v3, %v1549_v20  ;;  %v501_v7 = vpop.f32.mrb[54].mxu0  ;;  %v613_v8 = vadd.f32 %v612_v6, %v1552_v33  ;;  %v614_v10 = vpop.f32.mrb[54].mxu1 }
 0x147   :  { %v502_v9 = vadd.f32 %v501_v7, %v1543_v18  ;;  %v503_v11 = vpop.f32.mrb[55].mxu0  ;;  %v615_v13 = vadd.f32 %v614_v10, %v1546_v32  ;;  %v616_v15 = vpop.f32.mrb[55].mxu1 }
 0x148   :  { %v1257_v12 = vpack.c.bf16 %v500_v5, %v498_v1  ;;  %v504_v14 = vadd.f32 %v503_v11, %v1549_v20  ;;  %v1258_v16 = vpack.c.bf16 %v613_v8, %v611_v4  ;;  %v617_v17 = vadd.f32 %v616_v15, %v1552_v33 }
 0x14a   :  { %1065 = vst [vmem:[#allocation2 + $0x150] sm:$0xff] %v1257_v12  ;;  %v1261_v19 = vpack.c.bf16 %v504_v14, %v502_v9  ;;  %1066 = vst [vmem:[#allocation2 + $0x158] sm:$0xff] %v1258_v16  ;;  %v1262_v26 = vpack.c.bf16 %v617_v17, %v615_v13 }
 0x14c   :  { %1069 = vst [vmem:[#allocation2 + $0x170] sm:$0xff] %v1261_v19  ;;  %v507_v34 = vpop.f32.mrb[56].mxu0  ;;  %1070 = vst [vmem:[#allocation2 + $0x178] sm:$0xff] %v1262_v26  ;;  %v620_v21 = vpop.f32.mrb[56].mxu1 }
 0x14d   :  { %v508_v35 = vadd.f32 %v507_v34, %v1543_v18  ;;  %v509_v22 = vpop.f32.mrb[57].mxu0  ;;  %v621_v23 = vadd.f32 %v620_v21, %v1546_v32  ;;  %v622_v25 = vpop.f32.mrb[57].mxu1 }
 0x14e   :  { %v510_v24 = vadd.f32 %v509_v22, %v1549_v20  ;;  %v511_v27 = vpop.f32.mrb[58].mxu0  ;;  %v623_v29 = vadd.f32 %v622_v25, %v1552_v33  ;;  %v624_v31 = vpop.f32.mrb[58].mxu1 }
 0x14f   :  { %v512_v30 = vadd.f32 %v511_v27, %v1543_v18  ;;  %v513_v28 = vpop.f32.mrb[59].mxu0  ;;  %v625_v37 = vadd.f32 %v624_v31, %v1546_v32  ;;  %v626_v39 = vpop.f32.mrb[59].mxu1 }
 0x150   :  { %v1265_v36 = vpack.c.bf16 %v510_v24, %v508_v35  ;;  %v514_v38 = vadd.f32 %v513_v28, %v1549_v20  ;;  %v1266_v40 = vpack.c.bf16 %v623_v29, %v621_v23  ;;  %v627_v41 = vadd.f32 %v626_v39, %v1552_v33 }
 0x152   :  { %1073 = vst [vmem:[#allocation2 + $0x190] sm:$0xff] %v1265_v36  ;;  %v1269_v42 = vpack.c.bf16 %v514_v38, %v512_v30  ;;  %1074 = vst [vmem:[#allocation2 + $0x198] sm:$0xff] %v1266_v40  ;;  %v1270_v43 = vpack.c.bf16 %v627_v41, %v625_v37 }
 0x154   :  { %1077 = vst [vmem:[#allocation2 + $0x1b0] sm:$0xff] %v1269_v42  ;;  %v517_v44 = vpop.f32.mrb[60].mxu0  ;;  %1078 = vst [vmem:[#allocation2 + $0x1b8] sm:$0xff] %v1270_v43  ;;  %v630_v46 = vpop.f32.mrb[60].mxu1 }
 0x155   :  { %v518_v45 = vadd.f32 %v517_v44, %v1543_v18  ;;  %v519_v47 = vpop.f32.mrb[61].mxu0  ;;  %v631_v48 = vadd.f32 %v630_v46, %v1546_v32  ;;  %v632_v50 = vpop.f32.mrb[61].mxu1 }
 0x156   :  { %v520_v49 = vadd.f32 %v519_v47, %v1549_v20  ;;  %v521_v51 = vpop.f32.mrb[62].mxu0  ;;  %v633_v52 = vadd.f32 %v632_v50, %v1552_v33  ;;  %v634_v54 = vpop.f32.mrb[62].mxu1 }
 0x157   :  { %v522_v53 = vadd.f32 %v521_v51, %v1543_v18  ;;  %v523_v55 = vpop.f32.mrb[63].mxu0  ;;  %v635_v57 = vadd.f32 %v634_v54, %v1546_v32  ;;  %v636_v59 = vpop.f32.mrb[63].mxu1 }
 0x158   :  { %v1273_v56 = vpack.c.bf16 %v520_v49, %v518_v45  ;;  %v524_v58 = vadd.f32 %v523_v55, %v1549_v20  ;;  %v1274_v60 = vpack.c.bf16 %v633_v52, %v631_v48  ;;  %v637_v61 = vadd.f32 %v636_v59, %v1552_v33 }
 0x15a   :  { %1081 = vst [vmem:[#allocation2 + $0x1d0] sm:$0xff] %v1273_v56  ;;  %v1277_v62 = vpack.c.bf16 %v524_v58, %v522_v53  ;;  %1082 = vst [vmem:[#allocation2 + $0x1d8] sm:$0xff] %v1274_v60  ;;  %v1278_v63 = vpack.c.bf16 %v637_v61, %v635_v57 }
 0x15c   :  { %1085 = vst [vmem:[#allocation2 + $0x1f0] sm:$0xff] %v1277_v62  ;;  %1086 = vst [vmem:[#allocation2 + $0x1f8] sm:$0xff] %v1278_v63 }
 0x15d   :  { %1302 = shalt.err (!%p1299_p4)
}
 0x15e   :  { %s1303_s21 = scalar_lea.hbm %s1633_s3, 8192 }
 0x15f   :  { %p1304_p5 = scmp.ne.s32.totalorder %s1633_s3, %s1303_s21  ;;  %p1307_p6 = scmp.lt.u32.totalorder %s1303_s21, %s1633_s3 }
 0x161   :  { %p1309_p7 = pnand %p1307_p6, %p1304_p5 }
 0x163   :  { %1312 = shalt.err (!%p1309_p7)
}
 0x164   :  { %s1317_s26 = smov 512   ;;  %s1318_s27 = smov 32  }
 0x165   :  { %1098 = dma.vmem_to_hbm [thread:$0]  %s1093_s17, 8192, %s1633_s3, [#allocation3], %s1317_s26, %s1317_s26, %s1318_s27  }
 0x166   :  { %1313 = dma.done.wait [#allocation3], 8192  }
 0x167   :  { %1314 = vsyncadd [#allocation3], 4294959104 }
 0x168   :  { %1102 = vsyncpa [#allocation3], 1 }

</bundles_post_ra>
